<compile_context>
chip_gen: v6e
topology: v6e:2x2x1
jax: 0.10.0
libtpu: 0.0.40
codegen_flags: <defaults>
</compile_context>

<pallas_src>
import functools

import jax
import jax.numpy as jnp
from jax.experimental import pallas as pl
from jax.experimental.pallas import tpu as pltpu


def _round_up(x, m):
    return ((x + m - 1) // m) * m


def _usable_vmem_bytes():
    """Per-core VMEM capacity with ~15% headroom for compiler scratch/semaphores."""
    cap = 64 * 1024 * 1024          # safe default (v7x has 64 MiB per TensorCore)
    try:
        info = pltpu.get_tpu_info()
        cap = int(getattr(info, "vmem_capacity_bytes", cap))
    except Exception:
        pass
    return int(cap * 0.85)


def _choose_tiles(din, dout, b_pad, itemsize, budget, tn_req, tk_req):
    """Pick (tn, tk): as large as possible (512 preferred) while fitting VMEM."""
    din128 = _round_up(din, 128)
    dout128 = _round_up(dout, 128)
    tn = _round_up(min(tn_req or 512, dout128), 128)
    tk = _round_up(min(tk_req or 512, din128), 128)
    # v7x megacore: keep >= 2 tiles on the "parallel" n axis when it stays >= 256 wide
    # (only when the caller did not request an explicit tn).
    if tn_req is None and dout128 // tn < 2 and dout128 >= 512:
        tn = max(256, _round_up(dout128 // 2, 128))

    def estimate(tk_, tn_):
        din_p = _round_up(din, tk_)
        dout_p = _round_up(dout, tn_)
        x_bytes = 2 * b_pad * din_p * itemsize      # resident x (counted 2x, conservative)
        w_bytes = 2 * tk_ * tn_ * itemsize          # double-buffered weight tiles
        o_bytes = 2 * b_pad * tn_ * 4               # f32 output/accumulator block
        v_bytes = 2 * 3 * dout_p * 4                # resident bias/gamma/beta
        return x_bytes + w_bytes + o_bytes + v_bytes

    while estimate(tk, tn) > budget:
        if tk > 128:
            tk = max(128, _round_up(tk // 2, 128))
        elif tn > 128:
            tn = max(128, _round_up(tn // 2, 128))
        else:
            break
    return tn, tk


def fc_prepare(w, b, gamma, beta, *, mxu_dtype=jnp.bfloat16, eps=1e-5,
               tn=None, tk=None, batch_hint=128):
    """Pad / cast the static parameters once, outside the hot path."""
    w = jnp.asarray(w)
    din, dout = w.shape
    itemsize = jnp.dtype(mxu_dtype).itemsize
    sublane = 32 // itemsize                    # 8 f32 / 16 bf16 / 32 int8-fp8
    budget = _usable_vmem_bytes()
    tn, tk = _choose_tiles(din, dout, _round_up(batch_hint, sublane),
                           itemsize, budget, tn, tk)
    din_p = _round_up(din, tk)
    dout_p = _round_up(dout, tn)

    if (din_p, dout_p) == (din, dout):
        w_p = w.astype(mxu_dtype)
    else:
        w_p = jnp.zeros((din_p, dout_p), mxu_dtype).at[:din, :dout].set(
            w.astype(mxu_dtype))

    def pad_vec(v, fill):
        v = jnp.asarray(v, jnp.float32).reshape(1, -1)
        if dout_p == dout:
            return v
        return jnp.full((1, dout_p), fill, jnp.float32).at[:, :dout].set(v)

    return dict(w=w_p, b=pad_vec(b, 0.0), gamma=pad_vec(gamma, 1.0),
                beta=pad_vec(beta, 0.0),
                din=din, dout=dout, din_p=din_p, dout_p=dout_p,
                tn=tn, tk=tk, mxu_dtype=mxu_dtype, eps=eps,
                sublane=sublane, vmem_budget=budget)


def _fc_kernel(x_ref, w_ref, b_ref, g_ref, beta_ref, o_ref, *,
               batch, eps, tk, tn, x_resident):
    """Grid = (n_tiles, k_tiles); K innermost; o_ref doubles as the f32 accumulator."""
    n = pl.program_id(0)
    k = pl.program_id(1)

    @pl.when(k == 0)
    def _():
        o_ref[...] = jnp.zeros_like(o_ref)

    if x_resident:
        x_blk = x_ref[:, pl.ds(pl.multiple_of(k * tk, tk), tk)]
    else:
        x_blk = x_ref[...]
    o_ref[...] += jnp.dot(x_blk, w_ref[...], preferred_element_type=jnp.float32)

    @pl.when(k == pl.num_programs(1) - 1)
    def _():
        col = pl.ds(pl.multiple_of(n * tn, tn), tn)
        bias = b_ref[:, col]
        gamma = g_ref[:, col]
        beta = beta_ref[:, col]

        y = o_ref[...] + bias                               # (B_p, tn) f32
        inv_b = 1.0 / float(batch)
        if y.shape[0] != batch:                             # exclude padded batch rows
            row = jax.lax.broadcasted_iota(jnp.int32, y.shape, 0)
            valid = row < batch
            mean = jnp.sum(jnp.where(valid, y, 0.0), axis=0, keepdims=True) * inv_b
            d = jnp.where(valid, y - mean, 0.0)
        else:
            mean = jnp.sum(y, axis=0, keepdims=True) * inv_b
            d = y - mean
        var = jnp.sum(d * d, axis=0, keepdims=True) * inv_b  # biased, two-pass

        scale = gamma * jax.lax.rsqrt(var + eps)
        shift = beta - mean * scale
        o_ref[...] = jnp.maximum(y * scale + shift, 0.0).astype(o_ref.dtype)


def fc_forward(x, params):
    """x: (B, input_dim) -> (B, output_dim) float32 (training-mode BN + ReLU)."""
    b_sz, din = x.shape
    assert din == params["din"], "input feature dim mismatch"
    mxu_dtype = params["mxu_dtype"]
    itemsize = jnp.dtype(mxu_dtype).itemsize
    tn, tk = params["tn"], params["tk"]
    din_p, dout_p = params["din_p"], params["dout_p"]

    b_p = _round_up(max(b_sz, 1), params["sublane"])
    x = x.astype(mxu_dtype)
    if (b_p, din_p) != (b_sz, din):
        x_p = jnp.zeros((b_p, din_p), mxu_dtype).at[:b_sz, :din].set(x)
    else:
        x_p = x

    n_tiles = dout_p // tn
    k_tiles = din_p // tk

    # Keep x fully resident in VMEM unless it is large (then stream per-K tiles).
    x_bytes = b_p * din_p * itemsize
    x_resident = x_bytes <= params["vmem_budget"] // 4
    if x_resident:
        x_spec = pl.BlockSpec((b_p, din_p), lambda nn_, kk_: (0, 0))
    else:
        x_spec = pl.BlockSpec((b_p, tk), lambda nn_, kk_: (0, kk_))

    need = (2 * x_bytes + 2 * tk * tn * itemsize + 2 * b_p * tn * 4
            + 2 * 3 * dout_p * 4)
    vmem_limit = int(min(max(need * 3 // 2, 16 * 1024 * 1024),
                         params["vmem_budget"]))

    kernel = functools.partial(_fc_kernel, batch=b_sz, eps=params["eps"],
                               tk=tk, tn=tn, x_resident=x_resident)

    out_p = pl.pallas_call(
        kernel,
        out_shape=jax.ShapeDtypeStruct((b_p, dout_p), jnp.float32),
        grid=(n_tiles, k_tiles),
        in_specs=[
            x_spec,                                                 # x (resident / K-tiled)
            pl.BlockSpec((tk, tn), lambda nn_, kk_: (kk_, nn_)),    # W tile
            pl.BlockSpec((1, dout_p), lambda nn_, kk_: (0, 0)),     # bias  (resident)
            pl.BlockSpec((1, dout_p), lambda nn_, kk_: (0, 0)),     # gamma (resident)
            pl.BlockSpec((1, dout_p), lambda nn_, kk_: (0, 0)),     # beta  (resident)
        ],
        out_specs=pl.BlockSpec((b_p, tn), lambda nn_, kk_: (0, nn_)),
        compiler_params=pltpu.CompilerParams(
            dimension_semantics=("parallel", "arbitrary"),
            vmem_limit_bytes=vmem_limit,
        ),
    )(x_p, params["w"], params["b"], params["gamma"], params["beta"])

    if (b_p, dout_p) == (b_sz, params["dout"]):
        return out_p
    return out_p[:b_sz, :params["dout"]]


def _reference(x, w, b, gamma, beta, eps=1e-5):
    """Plain-JAX reference (training-mode BatchNorm1d semantics)."""
    y = x @ w + jnp.asarray(b).reshape(1, -1)
    mean = y.mean(axis=0, keepdims=True)
    var = ((y - mean) ** 2).mean(axis=0, keepdims=True)
    y_hat = (y - mean) / jnp.sqrt(var + eps)
    return jnp.maximum(y_hat * jnp.asarray(gamma).reshape(1, -1)
                       + jnp.asarray(beta).reshape(1, -1), 0.0)


if __name__ == "__main__":
    # ---- Test 1: module-sized shapes, exact f32 MXU path --------------------
    input_dim, output_dim, batch = 32, 16, 8
    key = jax.random.PRNGKey(0)
    kx, kw, kb = jax.random.split(key, 3)
    bound = 1.0 / (input_dim ** 0.5)
    w = jax.random.uniform(kw, (input_dim, output_dim), jnp.float32, -bound, bound)
    b = jax.random.uniform(kb, (1, output_dim), jnp.float32, -bound, bound)
    gamma = jnp.ones((1, output_dim), jnp.float32)   # BatchNorm1d weight init
    beta = jnp.zeros((1, output_dim), jnp.float32)   # BatchNorm1d bias init
    x = jax.random.normal(kx, (batch, input_dim), jnp.float32)

    params_f32 = fc_prepare(w, b, gamma, beta, mxu_dtype=jnp.float32)
    out = jax.block_until_ready(fc_forward(x, params_f32))
    ref = _reference(x, w, b, gamma, beta)
    assert out.shape == (batch, output_dim)
    assert jnp.allclose(out, ref, atol=1e-4, rtol=1e-4)

    # ---- Test 2: default bf16 MXU path, padded batch (12 -> 16) -------------
    in2, out2, bat2 = 256, 320, 12
    k2 = jax.random.PRNGKey(1)
    k2x, k2w, k2b, k2g, k2e = jax.random.split(k2, 5)
    bound2 = 1.0 / (in2 ** 0.5)
    w2 = jax.random.uniform(k2w, (in2, out2), jnp.float32, -bound2, bound2)
    b2 = jax.random.uniform(k2b, (1, out2), jnp.float32, -bound2, bound2)
    g2 = jax.random.uniform(k2g, (1, out2), jnp.float32, 0.5, 1.5)
    e2 = 0.1 * jax.random.normal(k2e, (1, out2), jnp.float32)
    x2 = jax.random.normal(k2x, (bat2, in2), jnp.float32)

    params_bf16 = fc_prepare(w2, b2, g2, e2)          # bf16 MXU operands (default)
    out_bf16 = jax.block_until_ready(fc_forward(x2, params_bf16))
    ref_bf16 = _reference(x2.astype(jnp.bfloat16).astype(jnp.float32),
                          w2.astype(jnp.bfloat16).astype(jnp.float32),
                          b2, g2, e2)
    assert jnp.allclose(out_bf16, ref_bf16, atol=1e-2, rtol=1e-2)

    # ---- Test 3: force multi-tile grid (2 K tiles x 3 N tiles), exact f32 ---
    params_tiled = fc_prepare(w2, b2, g2, e2, mxu_dtype=jnp.float32, tn=128, tk=128)
    out_tiled = jax.block_until_ready(fc_forward(x2, params_tiled))
    ref_f32 = _reference(x2, w2, b2, g2, e2)
    assert jnp.allclose(out_tiled, ref_f32, atol=1e-4, rtol=1e-4)

    print("KERNEL_OK")
</pallas_src>

<mosaic_0001>
module attributes {stable_mosaic.version = 11 : i64} {
  func.func @_fc_kernel(%arg0: i32, %arg1: i32, %arg2: memref<8x128xf32, #tpu.memory_space<vmem>>, %arg3: memref<128x128xf32, #tpu.memory_space<vmem>>, %arg4: memref<1x128xf32, #tpu.memory_space<vmem>>, %arg5: memref<1x128xf32, #tpu.memory_space<vmem>>, %arg6: memref<1x128xf32, #tpu.memory_space<vmem>>, %arg7: memref<8x128xf32, #tpu.memory_space<vmem>>) attributes {dimension_semantics = [#tpu.dimension_semantics<parallel>, #tpu.dimension_semantics<arbitrary>], iteration_bounds = array<i64: 1, 1>, scalar_prefetch = 0 : i64, scratch_operands = 0 : i64, tpu.core_type = #tpu.core_type<tc>, window_params = [{pipeline_mode = #tpu.pipeline_mode<synchronous>, transform_indices = @transform_0, window_bounds = array<i64: 8, 128>}, {transform_indices = @transform_1, window_bounds = array<i64: 128, 128>}, {pipeline_mode = #tpu.pipeline_mode<synchronous>, transform_indices = @transform_2, window_bounds = array<i64: 1, 128>}, {pipeline_mode = #tpu.pipeline_mode<synchronous>, transform_indices = @transform_3, window_bounds = array<i64: 1, 128>}, {pipeline_mode = #tpu.pipeline_mode<synchronous>, transform_indices = @transform_4, window_bounds = array<i64: 1, 128>}, {transform_indices = @transform_5, window_bounds = array<i64: 8, 128>}]} {
    %c0_i32 = arith.constant 0 : i32
    %0 = arith.cmpi eq, %arg1, %c0_i32 : i32
    %1 = arith.extui %0 : i1 to i32
    %c0_i32_0 = arith.constant 0 : i32
    %2 = arith.cmpi ne, %1, %c0_i32_0 : i32
    scf.if %2 {
      %cst_9 = arith.constant 0.000000e+00 : f32
      %15 = vector.broadcast %cst_9 : f32 to vector<8x128xf32>
      %c0_10 = arith.constant 0 : index
      %c0_11 = arith.constant 0 : index
      %16 = vector.load %arg7[%c0_10, %c0_11] : memref<8x128xf32, #tpu.memory_space<vmem>>, vector<8x128xf32>
      tpu.vector_store %arg7[%c0_10, %c0_11], %15 {strides = array<i32>} : memref<8x128xf32, #tpu.memory_space<vmem>>, vector<8x128xf32>,
    } else {
    }
    %c128_i32 = arith.constant 128 : i32
    %3 = arith.muli %arg1, %c128_i32 : i32
    %4 = tpu.assume_multiple %3, 128 : i32
    %c0 = arith.constant 0 : index
    %5 = arith.index_cast %4 : i32 to index
    %6 = vector.load %arg2[%c0, %5] : memref<8x128xf32, #tpu.memory_space<vmem>>, vector<8x128xf32>
    %c0_1 = arith.constant 0 : index
    %c0_2 = arith.constant 0 : index
    %7 = vector.load %arg7[%c0_1, %c0_2] : memref<8x128xf32, #tpu.memory_space<vmem>>, vector<8x128xf32>
    %c0_3 = arith.constant 0 : index
    %c0_4 = arith.constant 0 : index
    %8 = vector.load %arg3[%c0_3, %c0_4] : memref<128x128xf32, #tpu.memory_space<vmem>>, vector<128x128xf32>
    %cst = arith.constant dense<0.000000e+00> : vector<8x128xf32>
    %9 = tpu.matmul %6, %8, %cst {dimension_numbers = #tpu.dot_dimension_numbers<[1], [0], [0], [1], [0, 0, 1, 1], [], []>} : vector<8x128xf32>, vector<128x128xf32>, vector<8x128xf32> -> vector<8x128xf32>
    %10 = arith.addf %7, %9 : vector<8x128xf32>
    %c0_5 = arith.constant 0 : index
    %c0_6 = arith.constant 0 : index
    %11 = vector.load %arg7[%c0_5, %c0_6] : memref<8x128xf32, #tpu.memory_space<vmem>>, vector<8x128xf32>
    tpu.vector_store %arg7[%c0_5, %c0_6], %10 {strides = array<i32>} : memref<8x128xf32, #tpu.memory_space<vmem>>, vector<8x128xf32>,
    %c0_i32_7 = arith.constant 0 : i32
    %12 = arith.cmpi eq, %arg1, %c0_i32_7 : i32
    %13 = arith.extui %12 : i1 to i32
    %c0_i32_8 = arith.constant 0 : i32
    %14 = arith.cmpi ne, %13, %c0_i32_8 : i32
    scf.if %14 {
      %c128_i32_9 = arith.constant 128 : i32
      %15 = arith.muli %arg0, %c128_i32_9 : i32
      %16 = tpu.assume_multiple %15, 128 : i32
      %c0_10 = arith.constant 0 : index
      %17 = arith.index_cast %16 : i32 to index
      %18 = vector.load %arg4[%c0_10, %17] : memref<1x128xf32, #tpu.memory_space<vmem>>, vector<1x128xf32>
      %c0_11 = arith.constant 0 : index
      %19 = arith.index_cast %16 : i32 to index
      %20 = vector.load %arg5[%c0_11, %19] : memref<1x128xf32, #tpu.memory_space<vmem>>, vector<1x128xf32>
      %c0_12 = arith.constant 0 : index
      %21 = arith.index_cast %16 : i32 to index
      %22 = vector.load %arg6[%c0_12, %21] : memref<1x128xf32, #tpu.memory_space<vmem>>, vector<1x128xf32>
      %c0_13 = arith.constant 0 : index
      %c0_14 = arith.constant 0 : index
      %23 = vector.load %arg7[%c0_13, %c0_14] : memref<8x128xf32, #tpu.memory_space<vmem>>, vector<8x128xf32>
      %24 = vector.broadcast %18 : vector<1x128xf32> to vector<8x128xf32>
      %25 = arith.addf %23, %24 : vector<8x128xf32>
      %cst_15 = arith.constant dense<0.000000e+00> : vector<128xf32>
      %26 = vector.multi_reduction <add>, %25, %cst_15 [0] : vector<8x128xf32> to vector<128xf32>
      %27 = vector.shape_cast %26 : vector<128xf32> to vector<1x128xf32>
      %cst_16 = arith.constant 1.250000e-01 : f32
      %28 = vector.broadcast %cst_16 : f32 to vector<1x128xf32>
      %29 = arith.mulf %27, %28 : vector<1x128xf32>
      %30 = vector.broadcast %29 : vector<1x128xf32> to vector<8x128xf32>
      %31 = arith.subf %25, %30 : vector<8x128xf32>
      %32 = arith.mulf %31, %31 : vector<8x128xf32>
      %cst_17 = arith.constant dense<0.000000e+00> : vector<128xf32>
      %33 = vector.multi_reduction <add>, %32, %cst_17 [0] : vector<8x128xf32> to vector<128xf32>
      %34 = vector.shape_cast %33 : vector<128xf32> to vector<1x128xf32>
      %cst_18 = arith.constant 1.250000e-01 : f32
      %35 = vector.broadcast %cst_18 : f32 to vector<1x128xf32>
      %36 = arith.mulf %34, %35 : vector<1x128xf32>
      %cst_19 = arith.constant 9.99999974E-6 : f32
      %37 = vector.broadcast %cst_19 : f32 to vector<1x128xf32>
      %38 = arith.addf %36, %37 : vector<1x128xf32>
      %39 = math.rsqrt %38 : vector<1x128xf32>
      %40 = arith.mulf %20, %39 : vector<1x128xf32>
      %41 = arith.mulf %29, %40 : vector<1x128xf32>
      %42 = arith.subf %22, %41 : vector<1x128xf32>
      %43 = vector.broadcast %40 : vector<1x128xf32> to vector<8x128xf32>
      %44 = arith.mulf %25, %43 : vector<8x128xf32>
      %45 = vector.broadcast %42 : vector<1x128xf32> to vector<8x128xf32>
      %46 = arith.addf %44, %45 : vector<8x128xf32>
      %cst_20 = arith.constant 0.000000e+00 : f32
      %47 = vector.broadcast %cst_20 : f32 to vector<8x128xf32>
      %48 = arith.maximumf %46, %47 : vector<8x128xf32>
      %c0_21 = arith.constant 0 : index
      %c0_22 = arith.constant 0 : index
      %49 = vector.load %arg7[%c0_21, %c0_22] : memref<8x128xf32, #tpu.memory_space<vmem>>, vector<8x128xf32>
      tpu.vector_store %arg7[%c0_21, %c0_22], %48 {strides = array<i32>} : memref<8x128xf32, #tpu.memory_space<vmem>>, vector<8x128xf32>,
    } else {
    }
    return
  }
  func.func @transform_0(%arg0: i32, %arg1: i32) -> (i32, i32) {
    %c0_i32 = arith.constant 0 : i32
    %c0_i32_0 = arith.constant 0 : i32
    %c0_i32_1 = arith.constant 0 : i32
    return %c0_i32, %c0_i32_0 : i32, i32
  }
  func.func @transform_1(%arg0: i32, %arg1: i32) -> (i32, i32) {
    %c0_i32 = arith.constant 0 : i32
    return %arg1, %arg0 : i32, i32
  }
  func.func @transform_2(%arg0: i32, %arg1: i32) -> (i32, i32) {
    %c0_i32 = arith.constant 0 : i32
    %c0_i32_0 = arith.constant 0 : i32
    %c0_i32_1 = arith.constant 0 : i32
    return %c0_i32, %c0_i32_0 : i32, i32
  }
  func.func @transform_3(%arg0: i32, %arg1: i32) -> (i32, i32) {
    %c0_i32 = arith.constant 0 : i32
    %c0_i32_0 = arith.constant 0 : i32
    %c0_i32_1 = arith.constant 0 : i32
    return %c0_i32, %c0_i32_0 : i32, i32
  }
  func.func @transform_4(%arg0: i32, %arg1: i32) -> (i32, i32) {
    %c0_i32 = arith.constant 0 : i32
    %c0_i32_0 = arith.constant 0 : i32
    %c0_i32_1 = arith.constant 0 : i32
    return %c0_i32, %c0_i32_0 : i32, i32
  }
  func.func @transform_5(%arg0: i32, %arg1: i32) -> (i32, i32) {
    %c0_i32 = arith.constant 0 : i32
    %c0_i32_0 = arith.constant 0 : i32
    return %c0_i32, %arg0 : i32, i32
  }
}

</mosaic_0001>

<bundles_post_ra>
// kernel: tpu_custom_call.1
= control target key start
LH: loop header
LB: loop body
LE: loop exit
PB: predicated region body
PF: predicated region fallthrough
CT: control target
= control target key end

     0   :  { %10 = vsyncpa [#allocation3], 0  ;;  %s406_s0 = inlined_call_operand.hbm [shape: f32[8,128], index: 0, kind: input, shape index: {}]   ;;  %s407_s1 = inlined_call_operand.hbm [shape: f32[128,128], index: 1, kind: input, shape index: {}]   ;;  %s408_s2 = inlined_call_operand.vmem [shape: f32[1,128], index: 2, kind: input, shape index: {}]   ;;  %s409_s3 = inlined_call_operand.vmem [shape: f32[1,128], index: 3, kind: input, shape index: {}]   ;;  %s410_s4 = inlined_call_operand.vmem [shape: f32[1,128], index: 4, kind: input, shape index: {}]   ;;  %s411_s5 = inlined_call_operand.hbm [shape: f32[8,128], index: 5, kind: output, shape index: {}]  }
   0x1   :  { %11 = vsyncpa [#allocation6], 0 }
   0x2   :  { %12 = vsyncpa [#allocation4], 0  ;;  %s351_s18 = smov [#allocation2]   ;;  %s352_s20 = smov [#allocation5]  }
   0x3   :  { %s19_s19 = sshll.u32 %s351_s18, 4  ;;  %s28_s21 = sshll.u32 %s352_s20, 4  ;;  %s20_s19 = int_to_ptr.vmem [resolvable:$true] %s19_s19  ;;  %s29_s21 = int_to_ptr.vmem [resolvable:$true] %s28_s21 }
   0x4   :  { %s293_s22 = scalar_lea.vmem %s20_s19, 128  ;;  %p298_p1 = scmp.lt.s32.totalorder %s20_s19, %s20_s19 }
   0x5   :  { %p294_p0 = scmp.ne.s32.totalorder %s20_s19, %s293_s22  ;;  %p299_p2 = scmp.lt.s32.totalorder %s293_s22, %s293_s22 }
   0x7   :  { %p300_p3 = por %p299_p2, %p298_p1 }
   0x9   :  { %p301_p4 = pnand %p300_p3, %p294_p0 }
   0xb   :  { %304 = shalt.err (!%p301_p4)
}
   0xc   :  { %22 = dma.hbm_to_vmem [thread:$0]  %s406_s0, 128, %s20_s19, [#allocation3]  }
   0xd   :  { %s313_s25 = scalar_lea.vmem %s29_s21, 2048  ;;  %p318_p6 = scmp.lt.s32.totalorder %s29_s21, %s29_s21 }
   0xe   :  { %p314_p5 = scmp.ne.s32.totalorder %s29_s21, %s313_s25  ;;  %p319_p7 = scmp.lt.s32.totalorder %s313_s25, %s313_s25 }
  0x10   :  { %p320_p8 = por %p319_p7, %p318_p6 }
  0x12   :  { %p321_p9 = pnand %p320_p8, %p314_p5 }
  0x14   :  { %324 = shalt.err (!%p321_p9)
}
  0x15   :  { %s353_s26 = smov 128   ;;  %s354_s27 = smov 8  }
  0x16   :  { %34 = dma.hbm_to_vmem [thread:$0]  %s407_s1, 2048, %s29_s21, [#allocation6], %s353_s26, %s353_s26, %s354_s27  }
  0x17   :  { %345 = dma.done.wait [#allocation3], 128  }
  0x18   :  { %346 = vsyncadd [#allocation3], 4294967168 }
  0x19   :  { %347 = dma.done.wait [#allocation6], 2048  }
  0x1a   :  { %348 = vsyncadd [#allocation6], 4294965248  ;;  %v355_v0 = vmov 0.0   ;;  %vm356_vm0 = vmmov 0   ;;  %v73_v1 = vld [vmem:[#allocation5 + $0x78] sm:$0xff]  ;;  %v72_v2 = vld [vmem:[#allocation5 + $0x70] sm:$0xff]  ;;  %v188_v39 = vlaneseq }
  0x1b   :  { %241 = vmatprep.subr.mxu0 %v355_v0  ;;  %273 = vmatprep.mubr.msk.f32.mxu0 %vm356_vm0, %v355_v0  ;;  %v71_v3 = vld [vmem:[#allocation5 + $0x68] sm:$0xff]  ;;  %v70_v4 = vld [vmem:[#allocation5 + $0x60] sm:$0xff]  ;;  %v69_v5 = vld [vmem:[#allocation5 + $0x58] sm:$0xff]  ;;  %s357_s8 = smov [#allocation7]  }
  0x1c   :  { %242 = vmatpush3.msra.mxu0 %v73_v1  ;;  %v68_v6 = vld [vmem:[#allocation5 + $0x50] sm:$0xff]  ;;  %v67_v7 = vld [vmem:[#allocation5 + $0x48] sm:$0xff]  ;;  %v66_v8 = vld [vmem:[#allocation5 + $0x40] sm:$0xff]  ;;  %v189_v40 = vshrl.u32 %v188_v39, 7  ;;  %s209_s9 = sshll.u32 %s357_s8, 4  ;;  %s210_s9 = int_to_ptr.vmem [resolvable:$true] %s209_s9 }
  0x1d   :  { %243 = vmatprep.subr.mxu0 %v355_v0  ;;  %v65_v9 = vld [vmem:[#allocation5 + $0x38] sm:$0xff]  ;;  %v64_v10 = vld [vmem:[#allocation5 + $0x30] sm:$0xff]  ;;  %v63_v11 = vld [vmem:[#allocation5 + $0x28] sm:$0xff]  ;;  %s325_s10 = scalar_lea.vmem %s210_s9, 128  ;;  %p330_p11 = scmp.lt.s32.totalorder %s210_s9, %s210_s9 }
  0x1e   :  { %244 = vmatpush3.msra.mxu0 %v72_v2  ;;  %v62_v12 = vld [vmem:[#allocation5 + $0x20] sm:$0xff]  ;;  %v61_v13 = vld [vmem:[#allocation5 + $0x18] sm:$0xff]  ;;  %v60_v14 = vld [vmem:[#allocation5 + $0x10] sm:$0xff]  ;;  %v190_v42 = vsub.s32 0, %v189_v40  ;;  %p326_p10 = scmp.ne.s32.totalorder %s210_s9, %s325_s10  ;;  %p331_p12 = scmp.lt.s32.totalorder %s325_s10, %s325_s10 }
  0x1f   :  { %245 = vmatprep.subr.mxu0 %v355_v0  ;;  %v59_v15 = vld [vmem:[#allocation5 + $0x8] sm:$0xff]  ;;  %v58_v16 = vld [vmem:[#allocation5] sm:$0xff]  ;;  %v56_v17 = vld [vmem:[#allocation2] sm:$0xff] }
  0x20   :  { %246 = vmatpush3.msra.mxu0 %v71_v3  ;;  %v223_v19 = vld [vmem:[%s408_s2] ss:$0 sm:$0xff]  ;;  %p332_p13 = por %p331_p12, %p330_p11 }
  0x21   :  { %247 = vmatprep.subr.mxu0 %v355_v0  ;;  %v155_v41 = vld [vmem:[%s409_s3] sm:$0x1] }
  0x22   :  { %248 = vmatpush3.msra.mxu0 %v70_v4  ;;  %v157_v45 = vld [vmem:[%s410_s4] sm:$0x1]  ;;  %p333_p0 = pnand %p332_p13, %p326_p10 }
  0x23   :  { %249 = vmatprep.subr.mxu0 %v355_v0 }
  0x24   :  { %250 = vmatpush3.msra.mxu0 %v69_v5 }
  0x25   :  { %251 = vmatprep.subr.mxu0 %v355_v0 }
  0x26   :  { %252 = vmatpush3.msra.mxu0 %v68_v6 }
  0x27   :  { %253 = vmatprep.subr.mxu0 %v355_v0 }
  0x28   :  { %254 = vmatpush3.msra.mxu0 %v67_v7 }
  0x29   :  { %255 = vmatprep.subr.mxu0 %v355_v0 }
  0x2a   :  { %256 = vmatpush3.msra.mxu0 %v66_v8 }
  0x2b   :  { %257 = vmatprep.subr.mxu0 %v355_v0 }
  0x2c   :  { %258 = vmatpush3.msra.mxu0 %v65_v9 }
  0x2d   :  { %259 = vmatprep.subr.mxu0 %v355_v0 }
  0x2e   :  { %260 = vmatpush3.msra.mxu0 %v64_v10 }
  0x2f   :  { %261 = vmatprep.subr.mxu0 %v355_v0 }
  0x30   :  { %262 = vmatpush3.msra.mxu0 %v63_v11 }
  0x31   :  { %263 = vmatprep.subr.mxu0 %v355_v0 }
  0x32   :  { %264 = vmatpush3.msra.mxu0 %v62_v12 }
  0x33   :  { %265 = vmatprep.subr.mxu0 %v355_v0 }
  0x34   :  { %266 = vmatpush3.msra.mxu0 %v61_v13 }
  0x35   :  { %267 = vmatprep.subr.mxu0 %v355_v0 }
  0x36   :  { %268 = vmatpush3.msra.mxu0 %v60_v14 }
  0x37   :  { %269 = vmatprep.subr.mxu0 %v355_v0 }
  0x38   :  { %270 = vmatpush3.msra.mxu0 %v59_v15 }
  0x39   :  { %271 = vmatprep.subr.mxu0 %v355_v0 }
  0x3a   :  { %272 = vmatpush3.msra.mxu0 %v58_v16 }
  0x3b   :  { %274 = vmatmul.mubr.f32.vlgmr.msra.gmra.mxu0 %v56_v17 }
  0xfb   :  { %v140_v18 = vpop.f32.mrf.mxu0 }
  0xfc   :  { %v165_v21 = vadd.f32 %v223_v19, %v140_v18 }
  0xfd   :  { %v275_v20 = vpop.f32.mrf.mxu0 }
  0xfe   :  { %v166_v22 = vrot.slane %v165_v21, 4 }
 0x100   :  { %v167_v23 = vadd.f32 %v166_v22, %v165_v21 }
 0x102   :  { %v168_v24 = vrot.slane %v167_v23, 2 }
 0x104   :  { %v169_v25 = vadd.f32 %v168_v24, %v167_v23 }
 0x106   :  { %v170_v26 = vrot.slane %v169_v25, 1 }
 0x108   :  { %v171_v27 = vadd.f32 %v170_v26, %v169_v25 }
 0x10a   :  { %v172_v28 = vmul.f32 0.125, %v171_v27 }
 0x10c   :  { %v173_v29 = vsub.f32 %v165_v21, %v172_v28 }
 0x10e   :  { %v174_v30 = vmul.f32 %v173_v29, %v173_v29 }
 0x110   :  { %v175_v31 = vrot.slane %v174_v30, 4 }
 0x112   :  { %v176_v32 = vadd.f32 %v175_v31, %v174_v30 }
 0x114   :  { %v177_v33 = vrot.slane %v176_v32, 2 }
 0x116   :  { %v178_v34 = vadd.f32 %v177_v33, %v176_v32 }
 0x118   :  { %v179_v35 = vrot.slane %v178_v34, 1 }
 0x11a   :  { %v180_v36 = vadd.f32 %v179_v35, %v178_v34 }
 0x11c   :  { %v181_v37 = vmul.f32 0.125, %v180_v36 }
 0x11e   :  { %v182_v38 = vadd.f32 1e-05, %v181_v37 }
 0x120   :  { %283 = vrsqrt.f32 %v182_v38 }
 0x12d   :  { %v284_v43 = vpop.eup %283 }
 0x12e   :  { %v184_v44 = vmul.f32 %v284_v43, %v155_v41 }
 0x130   :  { %v185_v46 = vmul.f32 %v184_v44, %v172_v28  ;;  %v191_v47 = vrot.slane %v184_v44, %v190_v42 }
 0x132   :  { %v186_v48 = vsub.f32 %v157_v45, %v185_v46  ;;  %v193_v49 = vmul.f32 %v191_v47, %v165_v21 }
 0x134   :  { %v198_v50 = vrot.slane %v186_v48, %v190_v42 }
 0x136   :  { %v200_v51 = vadd.f32 %v198_v50, %v193_v49 }
 0x138   :  { %v201_v52 = vmax.f32 %v200_v51, 0.0 }
 0x13a   :  { %202 = vst [vmem:[#allocation7] sm:$0xff] %v201_v52 }
 0x13b   :  { %336 = shalt.err (!%p333_p0)
}
 0x13c   :  { %212 = dma.vmem_to_hbm [thread:$0]  %s210_s9, 128, %s411_s5, [#allocation4]  }
 0x13d   :  { %349 = dma.done.wait [#allocation4], 128  }
 0x13e   :  { %350 = vsyncadd [#allocation4], 4294967168 }
 0x13f   :  { %216 = vsyncpa [#allocation3], 1 }
 0x140   :  { %217 = vsyncpa [#allocation6], 1 }
 0x141   :  { %218 = vsyncpa [#allocation4], 1 }

</bundles_post_ra>
